<compile_context>
chip_gen: v7x
topology: tpu7x:2x2x1
jax: 0.10.0
libtpu: 0.0.40
codegen_flags: <defaults>
</compile_context>

<pallas_src>
import math

import jax
import jax.numpy as jnp
from jax.experimental import pallas as pl
from jax.experimental.pallas import tpu as pltpu

D_K = 8
N_HEADS = 4
D_MODEL = D_K * N_HEADS          # 32
NEG_BIG = -1e30                  # finite mask bias (no NaN for fully-masked rows)

# Row offsets inside the packed parameter/constant slab (lane width = 4*D = 128).
_ROW_QKV_BIAS = 4 * D_MODEL          # 128: [bq*scale | bk | bv | 0]
_ROW_BO = _ROW_QKV_BIAS + 1          # 129: [bo | 0]
_ROW_WO = _ROW_QKV_BIAS + 8          # 136: Wo padded to 128 lanes
_ROW_CONST = _ROW_WO + D_MODEL       # 168: head-expansion mask (L rows), then block-ones (L rows)


def mha_kernel(x_ref, bias_ref, p_ref, o_ref):
    """One grid step = one batch tile (M = b_tile * T tokens).

    x_ref    : (M, 128)  token rows, lanes [q | k | v | zero] (32 each) -> lane-dense,
                         and already the LHS of the fused QKV projection.
    bias_ref : (M, L)    additive score bias, L = n_heads*M; column h*M + m is key
                         token m for head h; 0 = attend, -1e30 = masked (covers both
                         key padding and cross-batch-row blocking).
    p_ref    : (R, 128)  packed params + structural constants (see _pack_params).
    o_ref    : (M, 128)  output rows; lanes 0:32 = result, 32:128 = zeros (full vst).
    """
    M = x_ref.shape[0]
    L = bias_ref.shape[1]
    D = D_MODEL
    H = N_HEADS
    assert L == H * M  # trace-time consistency check

    # ---- packed params (static sublane/lane slices) ----
    w_fused = p_ref[0:4 * D, :]                       # (128,128) block-diag [Wq*s; Wk; Wv; 0]
    qkv_b = p_ref[_ROW_QKV_BIAS:_ROW_QKV_BIAS + 1, :]  # (1,128)
    bo_w = p_ref[_ROW_BO:_ROW_BO + 1, :]               # (1,128)   zeros beyond lane 32
    wo_w = p_ref[_ROW_WO:_ROW_WO + D, :]               # (32,128)  zeros beyond lane 32
    he = p_ref[_ROW_CONST:_ROW_CONST + L, 0:D]         # (L,32)    head-expansion mask
    blk = p_ref[_ROW_CONST + L:_ROW_CONST + 2 * L, 0:L]  # (L,L)   per-head block of ones

    # ---- fused Q/K/V projection: ONE MXU push (1/sqrt(d_k) folded into Wq/bq) ----
    proj = jnp.dot(x_ref[...], w_fused, preferred_element_type=jnp.float32) + qkv_b
    qp = proj[:, 0:D]              # (M,32) pre-scaled queries
    kp = proj[:, D:2 * D]          # (M,32)
    vp = proj[:, 2 * D:3 * D]      # (M,32)

    # ---- head-stacked K/V: row h*M + m carries token m restricted to head h's dims ----
    k_stack = jnp.concatenate([kp] * H, axis=0) * he   # (L,32)
    v_stack = jnp.concatenate([vp] * H, axis=0) * he   # (L,32)

    # ---- all heads' scores in ONE matmul: s[q, h*M+m] = q_h[q] . k_h[m] ----
    s = jnp.einsum("md,ld->ml", qp, k_stack,
                   preferred_element_type=jnp.float32)              # (M,L)
    s = s + bias_ref[...]

    # Softmax per (row, head block).  Row-wide max is a valid stabilizer; masked
    # columns underflow to exactly 0 after exp.
    s_max = jnp.max(s, axis=-1, keepdims=True)
    e = jnp.exp(s - s_max)                                           # (M,L)
    # Per-(row, head) denominators via one block-ones matmul, already broadcast
    # across each head's M lanes (keeps everything in the (M, L) layout).
    denom = jnp.dot(e, blk, preferred_element_type=jnp.float32)      # (M,L)
    p = e * pl.reciprocal(denom + 1e-30, approx=True)

    # ---- stacked context (all heads, one push) + output projection (one push) ----
    ctx = jnp.dot(p, v_stack, preferred_element_type=jnp.float32)    # (M,32) head-concat
    # wo_w / bo_w are zero beyond lane 32 -> lanes 32:128 of the output are zero and
    # the store is a full-lane (unmasked) vst.
    o_ref[...] = jnp.dot(ctx, wo_w, preferred_element_type=jnp.float32) + bo_w


# --------------------------- wrapper-side packing ---------------------------
def _n_grid_steps(n_batch, seq_len):
    # The grid is a serial loop on single-TensorCore chips (v5e/v6e): only split the
    # batch when the device actually has 2 TensorCores (v7x; v4/v5p megacore) and
    # the split tiles cleanly.
    try:
        kind = jax.devices()[0].device_kind.lower()
    except Exception:
        kind = ""
    multi_tc = any(tag in kind for tag in ("v7", "v4", "v5p"))
    if multi_tc and n_batch % 2 == 0 and ((n_batch // 2) * seq_len) % 8 == 0:
        return 2
    return 1


def _pack_params(params, m_tile):
    """One (R,128) slab: block-diagonal fused QKV weight (q block pre-scaled by
    1/sqrt(d_k)), biases, Wo, and the shape-dependent structural constants of the
    head-stacked attention core."""
    D, H, DK = D_MODEL, N_HEADS, D_K
    L = H * m_tile
    scale = 1.0 / math.sqrt(DK)

    w_fused = jnp.zeros((4 * D, 4 * D), jnp.float32)
    w_fused = w_fused.at[0:D, 0:D].set(params["wq"] * scale)
    w_fused = w_fused.at[D:2 * D, D:2 * D].set(params["wk"])
    w_fused = w_fused.at[2 * D:3 * D, 2 * D:3 * D].set(params["wv"])

    vec = jnp.zeros((8, 4 * D), jnp.float32)
    vec = vec.at[0, 0:D].set(params["bq"][0] * scale)
    vec = vec.at[0, D:2 * D].set(params["bk"][0])
    vec = vec.at[0, 2 * D:3 * D].set(params["bv"][0])
    vec = vec.at[1, 0:D].set(params["bo"][0])

    wo_pad = jnp.zeros((D, 4 * D), jnp.float32).at[:, 0:D].set(params["wo"])

    head_of_dim = jnp.arange(D) // DK                     # head owning model dim d
    head_of_row = jnp.arange(L) // m_tile                 # head owning stacked row
    he = (head_of_row[:, None] == head_of_dim[None, :]).astype(jnp.float32)   # (L, D)
    he_pad = jnp.zeros((L, 4 * D), jnp.float32).at[:, 0:D].set(he)
    blk = (head_of_row[:, None] == head_of_row[None, :]).astype(jnp.float32)  # (L, L)
    blk_pad = jnp.zeros((L, 4 * D), jnp.float32).at[:, 0:L].set(blk)

    return jnp.concatenate([w_fused, vec, wo_pad, he_pad, blk_pad], axis=0)


def _pack_inputs(q, k, v):
    N, T, D = q.shape
    zeros = jnp.zeros((N * T, D), jnp.float32)
    return jnp.concatenate(
        [q.reshape(N * T, D), k.reshape(N * T, D), v.reshape(N * T, D), zeros],
        axis=-1).astype(jnp.float32)                       # (N*T, 128) lane-dense slab


def _make_bias(mask, n_steps, b_tile, seq_len):
    """Additive score bias in the kernel's head-stacked layout:
    bias[step*M + q, h*M + m] = 0 if (q, m in same batch row AND key m kept) else -1e30."""
    T = seq_len
    M = b_tile * T
    keep = mask.astype(jnp.float32).reshape(n_steps, M)                 # key token kept?
    same = jnp.kron(jnp.eye(b_tile, dtype=jnp.float32),
                    jnp.ones((T, T), jnp.float32))                      # (M, M) same batch row
    ok = (same[None, :, :] * keep[:, None, :]) > 0                      # (steps, M, M)
    bias = jnp.where(ok, 0.0, NEG_BIG).astype(jnp.float32)
    bias = jnp.tile(bias, (1, 1, N_HEADS))                              # (steps, M, H*M)
    return bias.reshape(n_steps * M, N_HEADS * M)


def multi_head_attention(q, k, v, j=None, mask=None, params=None):
    # `j` is accepted for signature parity with the PyTorch module; it is unused there too.
    del j
    N, T, D = q.shape
    assert D == D_MODEL
    if mask is None:
        mask = jnp.ones((N, T), jnp.float32)

    n_steps = _n_grid_steps(N, T)
    b_tile = N // n_steps
    m_tile = b_tile * T                      # tokens per grid step
    l_tile = N_HEADS * m_tile                # stacked-head key lanes per step

    x_slab = _pack_inputs(q, k, v)                       # (N*T, 128)
    bias = _make_bias(mask, n_steps, b_tile, T)          # (N*T, l_tile)
    p_slab = _pack_params(params, m_tile)                # (R, 128)

    # NOTE: at these toy sizes VMEM is irrelevant on all generations; if N*T scales
    # up, shrink b_tile (or raise vmem_limit_bytes) first on v7x (64 MiB VMEM).
    out = pl.pallas_call(
        mha_kernel,
        out_shape=jax.ShapeDtypeStruct((N * T, 4 * D), jnp.float32),
        grid_spec=pltpu.PrefetchScalarGridSpec(
            num_scalar_prefetch=0,
            grid=(n_steps,),
            in_specs=[
                pl.BlockSpec((m_tile, 4 * D), lambda b: (b, 0)),   # packed q|k|v tokens
                pl.BlockSpec((m_tile, l_tile), lambda b: (b, 0)),  # additive score bias
                pl.BlockSpec(p_slab.shape, lambda b: (0, 0)),      # params + constants
            ],
            out_specs=pl.BlockSpec((m_tile, 4 * D), lambda b: (b, 0)),
        ),
        compiler_params=pltpu.CompilerParams(
            dimension_semantics=("parallel",)),
    )(x_slab, bias, p_slab)

    # Lanes >= D are zeros written only to keep stores full-lane; strip them here.
    return out[:, 0:D].reshape(N, T, D)


# ---------------- parameter init (PyTorch nn.Linear-like) ----------------
def init_params(key):
    keys = jax.random.split(key, 4)

    def linear(kk, fan_in, fan_out):
        kw, kb = jax.random.split(kk)
        bound = 1.0 / math.sqrt(fan_in)
        w = jax.random.uniform(kw, (fan_in, fan_out), jnp.float32, -bound, bound)
        b = jax.random.uniform(kb, (1, fan_out), jnp.float32, -bound, bound)
        return w, b

    wq, bq = linear(keys[0], D_MODEL, D_K * N_HEADS)
    wk, bk = linear(keys[1], D_MODEL, D_K * N_HEADS)
    wv, bv = linear(keys[2], D_MODEL, D_K * N_HEADS)
    wo, bo = linear(keys[3], D_K * N_HEADS, D_MODEL)
    return dict(wq=wq, bq=bq, wk=wk, bk=bk, wv=wv, bv=bv, wo=wo, bo=bo)


# ---------------- pure-JAX reference (mirrors the PyTorch forward) ----------------
def reference(q, k, v, mask, p):
    N, T, D = q.shape
    qp = (q @ p["wq"] + p["bq"]).reshape(N, T, N_HEADS, D_K).transpose(0, 2, 1, 3)
    kp = (k @ p["wk"] + p["bk"]).reshape(N, T, N_HEADS, D_K).transpose(0, 2, 1, 3)
    vp = (v @ p["wv"] + p["bv"]).reshape(N, T, N_HEADS, D_K).transpose(0, 2, 1, 3)
    s = jnp.einsum("nhqd,nhkd->nhqk", qp, kp) / math.sqrt(D_K)
    s = jnp.where(mask[:, None, None, :] == 0, -jnp.inf, s)
    w = jax.nn.softmax(s, axis=-1)
    a = jnp.einsum("nhqk,nhkd->nhqd", w, vp).transpose(0, 2, 1, 3).reshape(N, T, D)
    return a @ p["wo"] + p["bo"]


if __name__ == "__main__":
    N, T = 4, 8
    key = jax.random.PRNGKey(0)
    kq, kk, kv, kp = jax.random.split(key, 4)
    q = jax.random.normal(kq, (N, T, D_MODEL), jnp.float32)
    k = jax.random.normal(kk, (N, T, D_MODEL), jnp.float32)
    v = jax.random.normal(kv, (N, T, D_MODEL), jnp.float32)
    mask = jnp.ones((N, T), jnp.float32).at[1, 6:].set(0.0).at[3, 5:].set(0.0)
    params = init_params(kp)

    out = multi_head_attention(q, k, v, j=None, mask=mask, params=params)
    out = jax.block_until_ready(out)

    ref = reference(q, k, v, mask, params)
    assert out.shape == (N, T, D_MODEL)
    err = float(jnp.max(jnp.abs(out - ref)))
    assert jnp.allclose(out, ref, atol=1e-2, rtol=1e-2), err
    print("KERNEL_OK")
</pallas_src>

<mosaic_0001>
module attributes {stable_mosaic.version = 11 : i64} {
  func.func @mha_kernel(%arg0: i32, %arg1: memref<32x128xf32, #tpu.memory_space<vmem>>, %arg2: memref<32x128xf32, #tpu.memory_space<vmem>>, %arg3: memref<424x128xf32, #tpu.memory_space<vmem>>, %arg4: memref<32x128xf32, #tpu.memory_space<vmem>>) attributes {dimension_semantics = [#tpu.dimension_semantics<parallel>], iteration_bounds = array<i64: 1>, scalar_prefetch = 0 : i64, scratch_operands = 0 : i64, tpu.core_type = #tpu.core_type<tc>, window_params = [{transform_indices = @transform_0, window_bounds = array<i64: 32, 128>}, {transform_indices = @transform_1, window_bounds = array<i64: 32, 128>}, {pipeline_mode = #tpu.pipeline_mode<synchronous>, transform_indices = @transform_2, window_bounds = array<i64: 424, 128>}, {transform_indices = @transform_3, window_bounds = array<i64: 32, 128>}]} {
    %c0 = arith.constant 0 : index
    %c0_0 = arith.constant 0 : index
    %0 = vector.load %arg3[%c0, %c0_0] : memref<424x128xf32, #tpu.memory_space<vmem>>, vector<128x128xf32>
    %c128 = arith.constant 128 : index
    %c0_1 = arith.constant 0 : index
    %1 = vector.load %arg3[%c128, %c0_1] : memref<424x128xf32, #tpu.memory_space<vmem>>, vector<1x128xf32>
    %c129 = arith.constant 129 : index
    %c0_2 = arith.constant 0 : index
    %2 = vector.load %arg3[%c129, %c0_2] : memref<424x128xf32, #tpu.memory_space<vmem>>, vector<1x128xf32>
    %c136 = arith.constant 136 : index
    %c0_3 = arith.constant 0 : index
    %3 = vector.load %arg3[%c136, %c0_3] : memref<424x128xf32, #tpu.memory_space<vmem>>, vector<32x128xf32>
    %c168 = arith.constant 168 : index
    %c0_4 = arith.constant 0 : index
    %4 = vector.load %arg3[%c168, %c0_4] : memref<424x128xf32, #tpu.memory_space<vmem>>, vector<128x32xf32>
    %c296 = arith.constant 296 : index
    %c0_5 = arith.constant 0 : index
    %5 = vector.load %arg3[%c296, %c0_5] : memref<424x128xf32, #tpu.memory_space<vmem>>, vector<128x128xf32>
    %c0_6 = arith.constant 0 : index
    %c0_7 = arith.constant 0 : index
    %6 = vector.load %arg1[%c0_6, %c0_7] : memref<32x128xf32, #tpu.memory_space<vmem>>, vector<32x128xf32>
    %cst = arith.constant dense<0.000000e+00> : vector<32x128xf32>
    %7 = tpu.matmul %6, %0, %cst {dimension_numbers = #tpu.dot_dimension_numbers<[1], [0], [0], [1], [0, 0, 1, 1], [], []>} : vector<32x128xf32>, vector<128x128xf32>, vector<32x128xf32> -> vector<32x128xf32>
    %8 = vector.broadcast %1 : vector<1x128xf32> to vector<32x128xf32>
    %9 = arith.addf %7, %8 : vector<32x128xf32>
    %10 = vector.extract_strided_slice %9 {offsets = [0, 0], sizes = [32, 32], strides = [1, 1]} : vector<32x128xf32> to vector<32x32xf32>
    %11 = vector.extract_strided_slice %9 {offsets = [0, 32], sizes = [32, 32], strides = [1, 1]} : vector<32x128xf32> to vector<32x32xf32>
    %12 = vector.extract_strided_slice %9 {offsets = [0, 64], sizes = [32, 32], strides = [1, 1]} : vector<32x128xf32> to vector<32x32xf32>
    %13 = tpu.concatenate %11, %11, %11, %11 in 0 : vector<32x32xf32>, vector<32x32xf32>, vector<32x32xf32>, vector<32x32xf32> -> vector<128x32xf32>
    %14 = arith.mulf %13, %4 : vector<128x32xf32>
    %15 = tpu.concatenate %12, %12, %12, %12 in 0 : vector<32x32xf32>, vector<32x32xf32>, vector<32x32xf32>, vector<32x32xf32> -> vector<128x32xf32>
    %16 = arith.mulf %15, %4 : vector<128x32xf32>
    "tpu.trace_start"() <{level = 10 : i32, message = "md,ld->ml"}> : () -> ()
    %cst_8 = arith.constant dense<0.000000e+00> : vector<32x128xf32>
    %17 = tpu.matmul %10, %14, %cst_8 {dimension_numbers = #tpu.dot_dimension_numbers<[1], [1], [0], [0], [0, 0, 1, 0], [], []>} : vector<32x32xf32>, vector<128x32xf32>, vector<32x128xf32> -> vector<32x128xf32>
    "tpu.trace_stop"() : () -> ()
    %c0_9 = arith.constant 0 : index
    %c0_10 = arith.constant 0 : index
    %18 = vector.load %arg2[%c0_9, %c0_10] : memref<32x128xf32, #tpu.memory_space<vmem>>, vector<32x128xf32>
    %19 = arith.addf %17, %18 : vector<32x128xf32>
    %cst_11 = arith.constant dense<0xFF800000> : vector<32xf32>
    %20 = vector.multi_reduction <maximumf>, %19, %cst_11 [1] : vector<32x128xf32> to vector<32xf32>
    %21 = vector.shape_cast %20 : vector<32xf32> to vector<32x1xf32>
    %22 = vector.broadcast %21 : vector<32x1xf32> to vector<32x128xf32>
    %23 = arith.subf %19, %22 : vector<32x128xf32>
    %24 = math.exp %23 : vector<32x128xf32>
    %cst_12 = arith.constant dense<0.000000e+00> : vector<32x128xf32>
    %25 = tpu.matmul %24, %5, %cst_12 {dimension_numbers = #tpu.dot_dimension_numbers<[1], [0], [0], [1], [0, 0, 1, 1], [], []>} : vector<32x128xf32>, vector<128x128xf32>, vector<32x128xf32> -> vector<32x128xf32>
    %cst_13 = arith.constant 1.000000e-30 : f32
    %26 = vector.broadcast %cst_13 : f32 to vector<32x128xf32>
    %27 = arith.addf %25, %26 : vector<32x128xf32>
    %28 = tpu.reciprocal %27 {approx = true} : vector<32x128xf32> -> vector<32x128xf32>
    %29 = arith.mulf %24, %28 : vector<32x128xf32>
    %cst_14 = arith.constant dense<0.000000e+00> : vector<32x32xf32>
    %30 = tpu.matmul %29, %16, %cst_14 {dimension_numbers = #tpu.dot_dimension_numbers<[1], [0], [0], [1], [0, 0, 1, 1], [], []>} : vector<32x128xf32>, vector<128x32xf32>, vector<32x32xf32> -> vector<32x32xf32>
    %cst_15 = arith.constant dense<0.000000e+00> : vector<32x128xf32>
    %31 = tpu.matmul %30, %3, %cst_15 {dimension_numbers = #tpu.dot_dimension_numbers<[1], [0], [0], [1], [0, 0, 1, 1], [], []>} : vector<32x32xf32>, vector<32x128xf32>, vector<32x128xf32> -> vector<32x128xf32>
    %32 = vector.broadcast %2 : vector<1x128xf32> to vector<32x128xf32>
    %33 = arith.addf %31, %32 : vector<32x128xf32>
    %c0_16 = arith.constant 0 : index
    %c0_17 = arith.constant 0 : index
    %34 = vector.load %arg4[%c0_16, %c0_17] : memref<32x128xf32, #tpu.memory_space<vmem>>, vector<32x128xf32>
    tpu.vector_store %arg4[%c0_16, %c0_17], %33 {strides = array<i32>} : memref<32x128xf32, #tpu.memory_space<vmem>>, vector<32x128xf32>,
    return
  }
  func.func @transform_0(%arg0: i32) -> (i32, i32) {
    %c0_i32 = arith.constant 0 : i32
    %c0_i32_0 = arith.constant 0 : i32
    return %arg0, %c0_i32 : i32, i32
  }
  func.func @transform_1(%arg0: i32) -> (i32, i32) {
    %c0_i32 = arith.constant 0 : i32
    %c0_i32_0 = arith.constant 0 : i32
    return %arg0, %c0_i32 : i32, i32
  }
  func.func @transform_2(%arg0: i32) -> (i32, i32) {
    %c0_i32 = arith.constant 0 : i32
    %c0_i32_0 = arith.constant 0 : i32
    %c0_i32_1 = arith.constant 0 : i32
    return %c0_i32, %c0_i32_0 : i32, i32
  }
  func.func @transform_3(%arg0: i32) -> (i32, i32) {
    %c0_i32 = arith.constant 0 : i32
    %c0_i32_0 = arith.constant 0 : i32
    return %arg0, %c0_i32 : i32, i32
  }
}

</mosaic_0001>

<bundles_post_ra>
// kernel: tpu_custom_call.1
= control target key start
LH: loop header
LB: loop body
LE: loop exit
PB: predicated region body
PF: predicated region fallthrough
CT: control target
= control target key end

     0   :  { %8 = vsyncpa [#allocation3], 0  ;;  %s1851_s0 = inlined_call_operand.hbm [shape: f32[32,128], index: 0, kind: input, shape index: {}]   ;;  %s1852_s1 = inlined_call_operand.hbm [shape: f32[32,128], index: 1, kind: input, shape index: {}]   ;;  %s1853_s2 = inlined_call_operand.hbm [shape: f32[424,128], index: 2, kind: input, shape index: {}]   ;;  %s1854_s3 = inlined_call_operand.hbm [shape: f32[32,128], index: 3, kind: output, shape index: {}]  }
   0x1   :  { %9 = vsyncpa [#allocation6], 0 }
   0x2   :  { %10 = vsyncpa [#allocation4], 0  ;;  %s1545_s12 = smov [#allocation5]   ;;  %s1546_s14 = smov [#allocation2]  }
   0x3   :  { %s28_s13 = sshll.u32 %s1545_s12, 4  ;;  %s16_s15 = sshll.u32 %s1546_s14, 4  ;;  %s29_s13 = int_to_ptr.vmem [resolvable:$true] %s28_s13  ;;  %s1574_s15 = int_to_ptr.vmem [resolvable:$true] %s16_s15 }
   0x4   :  { %s1451_s18 = scalar_lea.hbm %s1852_s1, 512 }
   0x5   :  { %p1452_p0 = scmp.ne.s32.totalorder %s1852_s1, %s1451_s18  ;;  %p1455_p1 = scmp.lt.u32.totalorder %s1451_s18, %s1852_s1 }
   0x7   :  { %p1457_p2 = pnand %p1455_p1, %p1452_p0 }
   0x9   :  { %1460 = shalt.err (!%p1457_p2)
}
   0xa   :  { %s1461_s23 = scalar_lea.vmem %s29_s13, 512  ;;  %p1466_p4 = scmp.lt.s32.totalorder %s29_s13, %s29_s13 }
   0xb   :  { %p1462_p3 = scmp.ne.s32.totalorder %s29_s13, %s1461_s23  ;;  %p1467_p5 = scmp.lt.s32.totalorder %s1461_s23, %s1461_s23 }
   0xd   :  { %p1468_p6 = por %p1467_p5, %p1466_p4 }
   0xf   :  { %p1469_p7 = pnand %p1468_p6, %p1462_p3 }
  0x11   :  { %1472 = shalt.err (!%p1469_p7)
}
  0x12   :  { %s1547_s24 = smov 128   ;;  %s1548_s25 = smov 8  }
  0x13   :  { %34 = dma.hbm_to_vmem [thread:$0]  %s1852_s1, 512, %s29_s13, [#allocation6], %s1547_s24, %s1547_s24, %s1548_s25  }
  0x14   :  { %s1473_s30 = scalar_lea.hbm %s1851_s0, 512 }
  0x15   :  { %p1474_p8 = scmp.ne.s32.totalorder %s1851_s0, %s1473_s30  ;;  %p1477_p9 = scmp.lt.u32.totalorder %s1473_s30, %s1851_s0 }
  0x17   :  { %p1479_p10 = pnand %p1477_p9, %p1474_p8 }
  0x19   :  { %1482 = shalt.err (!%p1479_p10)
}
  0x1a   :  { %s1483_s8 = scalar_lea.vmem %s1574_s15, 512  ;;  %p1488_p12 = scmp.lt.s32.totalorder %s1574_s15, %s1574_s15 }
  0x1b   :  { %p1484_p11 = scmp.ne.s32.totalorder %s1574_s15, %s1483_s8  ;;  %p1489_p13 = scmp.lt.s32.totalorder %s1483_s8, %s1483_s8 }
  0x1d   :  { %p1490_p0 = por %p1489_p13, %p1488_p12 }
  0x1f   :  { %p1491_p1 = pnand %p1490_p0, %p1484_p11 }
  0x21   :  { %1494 = shalt.err (!%p1491_p1)
}
  0x22   :  { %22 = dma.hbm_to_vmem [thread:$0]  %s1851_s0, 512, %s1574_s15, [#allocation3], %s1547_s24, %s1547_s24, %s1548_s25  }
  0x23   :  { %s1549_s10 = smov [#allocation7]   ;;  %s1495_s14 = scalar_lea.hbm %s1853_s2, 6784 }
  0x24   :  { %s40_s11 = sshll.u32 %s1549_s10, 4  ;;  %p1496_p2 = scmp.ne.s32.totalorder %s1853_s2, %s1495_s14  ;;  %s41_s11 = int_to_ptr.vmem [resolvable:$true] %s40_s11 }
  0x25   :  { %p1499_p3 = scmp.lt.u32.totalorder %s1495_s14, %s1853_s2 }
  0x27   :  { %p1501_p4 = pnand %p1499_p3, %p1496_p2 }
  0x29   :  { %1504 = shalt.err (!%p1501_p4)
}
  0x2a   :  { %s1505_s20 = scalar_lea.vmem %s41_s11, 6784  ;;  %p1510_p6 = scmp.lt.s32.totalorder %s41_s11, %s41_s11 }
  0x2b   :  { %p1506_p5 = scmp.ne.s32.totalorder %s41_s11, %s1505_s20  ;;  %p1511_p7 = scmp.lt.s32.totalorder %s1505_s20, %s1505_s20 }
  0x2d   :  { %p1512_p8 = por %p1511_p7, %p1510_p6 }
  0x2f   :  { %p1513_p9 = pnand %p1512_p8, %p1506_p5 }
  0x31   :  { %1516 = shalt.err (!%p1513_p9)
}
  0x32   :  { %46 = dma.hbm_to_vmem [thread:$0]  %s1853_s2, 6784, %s41_s11, [#allocation6], %s1547_s24, %s1547_s24, %s1548_s25  }
  0x33   :  { %1539 = dma.done.wait [#allocation3], 512  }
  0x34   :  { %1540 = vsyncadd [#allocation3], 4294966784 }
  0x35   :  { %1541 = dma.done.wait [#allocation6], 7296  }
  0x36   :  { %1542 = vsyncadd [#allocation6], 4294960000  ;;  %v56_v0 = vld [vmem:[#allocation7] sm:$0xff]  ;;  %v57_v1 = vld [vmem:[#allocation7 + $0x8] sm:$0xff]  ;;  %s1550_s2 = smov 32   ;;  %vm399_vm0 = vcmask 261120  }
  0x37   :  { %v58_v2 = vld [vmem:[#allocation7 + $0x10] sm:$0xff]  ;;  %v1194_v3 = vpack.c.bf16 %v57_v1, %v56_v0  ;;  %v59_v4 = vld [vmem:[#allocation7 + $0x18] sm:$0xff]  ;;  %v60_v6 = vld [vmem:[#allocation7 + $0x20] sm:$0xff]  ;;  %s1551_s21 = smov 96   ;;  %s1552_s22 = smov 64  }
  0x38   :  { %v1198_v5 = vpack.c.bf16 %v59_v4, %v58_v2  ;;  %v61_v7 = vld [vmem:[#allocation7 + $0x28] sm:$0xff]  ;;  %v110_v9 = vld [vmem:[#allocation2] sm:$0xff]  ;;  %v62_v10 = vld [vmem:[#allocation7 + $0x30] sm:$0xff]  ;;  %s1553_s23 = smov [#allocation8]  }
  0x39   :  { %1195 = vmatprep.subr.bf16.mxu0 %v1194_v3  ;;  %v1202_v8 = vpack.c.bf16 %v61_v7, %v60_v6  ;;  %v63_v11 = vld [vmem:[#allocation7 + $0x38] sm:$0xff]  ;;  %1060 = vmatprep.mubr.f32.mxu0 %v110_v9  ;;  %v1630_v13 = vld [vmem:[#allocation7 + $0xa8] sm:$0xff]  ;;  %v1634_v14 = vld [vmem:[#allocation7 + $0xc0] sm:$0xff]  ;;  %s901_s26 = sshll.u32 %s1553_s23, 4  ;;  %s902_s26 = int_to_ptr.vmem [resolvable:$true] %s901_s26 }
  0x3a   :  { %1197 = vmatpush3.bf16.msra.mxu0 %v1194_v3  ;;  %v1626_v12 = vld [vmem:[#allocation7 + $0xb8] sm:$0xff]  ;;  %219 = vrot.lane.b32.xlu0 %v1630_v13, %s1550_s2  ;;  %v1206_v15 = vpack.c.bf16 %v63_v11, %v62_v10  ;;  %v1636_v16 = vld [vmem:[#allocation7 + $0xb0] sm:$0xff]  ;;  %v64_v17 = vld [vmem:[#allocation7 + $0x40] sm:$0xff]  ;;  %s1517_s27 = scalar_lea.vmem %s902_s26, 512  ;;  %p1522_p11 = scmp.lt.s32.totalorder %s902_s26, %s902_s26 }
  0x3b   :  { %1199 = vmatprep.subr.bf16.mxu0 %v1198_v5  ;;  %223 = vrot.lane.b32.xlu1 %v1626_v12, %s1550_s2  ;;  %v65_v18 = vld [vmem:[#allocation7 + $0x48] sm:$0xff]  ;;  %v1642_v19 = vld [vmem:[#allocation7 + $0xd0] sm:$0xff]  ;;  %v67_v23 = vld [vmem:[#allocation7 + $0x58] sm:$0xff]  ;;  %p1518_p10 = scmp.ne.s32.totalorder %s902_s26, %s1517_s27  ;;  %p1523_p12 = scmp.lt.s32.totalorder %s1517_s27, %s1517_s27 }
  0x3c   :  { %v1210_v20 = vpack.c.bf16 %v65_v18, %v64_v17  ;;  %v1644_v21 = vld [vmem:[#allocation7 + $0xc8] sm:$0xff]  ;;  %v66_v22 = vld [vmem:[#allocation7 + $0x50] sm:$0xff]  ;;  %v1650_v24 = vld [vmem:[#allocation7 + $0xe0] sm:$0xff] }
  0x3d   :  { %v1214_v25 = vpack.c.bf16 %v67_v23, %v66_v22  ;;  %v1652_v26 = vld [vmem:[#allocation7 + $0xd8] sm:$0xff]  ;;  %v68_v27 = vld [vmem:[#allocation7 + $0x60] sm:$0xff]  ;;  %v69_v28 = vld [vmem:[#allocation7 + $0x68] sm:$0xff]  ;;  %p1524_p13 = por %p1523_p12, %p1522_p11 }
  0x3e   :  { %1201 = vmatpush3.bf16.msra.mxu0 %v1198_v5  ;;  %221 = vrot.lane.b32.xlu0 %v1636_v16, %s1550_s2  ;;  %v1658_v29 = vld [vmem:[#allocation7 + $0xf0] sm:$0xff]  ;;  %v1218_v30 = vpack.c.bf16 %v69_v28, %v68_v27  ;;  %v1660_v31 = vld [vmem:[#allocation7 + $0xe8] sm:$0xff]  ;;  %v71_v33 = vld [vmem:[#allocation7 + $0x78] sm:$0xff] }
  0x3f   :  { %1203 = vmatprep.subr.bf16.mxu0 %v1202_v8  ;;  %225 = vrot.lane.b32.xlu1 %v1634_v14, %s1550_s2  ;;  %v70_v32 = vld [vmem:[#allocation7 + $0x70] sm:$0xff]  ;;  %v1666_v34 = vld [vmem:[#allocation7 + $0x100] sm:$0xff]  ;;  %v1668_v36 = vld [vmem:[#allocation7 + $0xf8] sm:$0xff]  ;;  %p1525_p0 = pnand %p1524_p13, %p1518_p10 }
  0x40   :  { %v1222_v35 = vpack.c.bf16 %v71_v33, %v70_v32  ;;  %v1674_v37 = vld [vmem:[#allocation7 + $0x110] sm:$0xff]  ;;  %v1676_v38 = vld [vmem:[#allocation7 + $0x108] sm:$0xff]  ;;  %v1682_v40 = vld [vmem:[#allocation7 + $0x120] sm:$0xff] }
  0x41   :  { %v111_v39 = vld [vmem:[#allocation2 + $0x8] sm:$0xff]  ;;  %v112_v41 = vld [vmem:[#allocation2 + $0x10] sm:$0xff]  ;;  %v1684_v42 = vld [vmem:[#allocation7 + $0x118] sm:$0xff] }
  0x42   :  { %1205 = vmatpush3.bf16.msra.mxu0 %v1202_v8  ;;  %227 = vrot.lane.b32.xlu0 %v1644_v21, %s1550_s2  ;;  %v113_v43 = vld [vmem:[#allocation2 + $0x18] sm:$0xff]  ;;  %v914_v53 = vld [vmem:[#allocation7 + $0x80] ss:$0 sm:$0xff]  ;;  %vm1718_vm1 = vmpackc.low %vm399_vm0, %vm399_vm0 }
  0x43   :  { %1207 = vmatprep.subr.bf16.mxu0 %v1206_v15  ;;  %229 = vrot.lane.b32.xlu1 %v1642_v19, %s1550_s2 }
  0x46   :  { %1209 = vmatpush3.bf16.msra.mxu0 %v1206_v15  ;;  %231 = vrot.lane.b32.xlu0 %v1652_v26, %s1550_s2 }
  0x47   :  { %1211 = vmatprep.subr.bf16.mxu0 %v1210_v20  ;;  %233 = vrot.lane.b32.xlu1 %v1650_v24, %s1550_s2 }
  0x4a   :  { %1213 = vmatpush3.bf16.msra.mxu0 %v1210_v20  ;;  %235 = vrot.lane.b32.xlu0 %v1660_v31, %s1550_s2 }
  0x4b   :  { %1215 = vmatprep.subr.bf16.mxu0 %v1214_v25  ;;  %237 = vrot.lane.b32.xlu1 %v1658_v29, %s1550_s2 }
  0x4e   :  { %1217 = vmatpush3.bf16.msra.mxu0 %v1214_v25  ;;  %239 = vrot.lane.b32.xlu0 %v1668_v36, %s1550_s2 }
  0x4f   :  { %1219 = vmatprep.subr.bf16.mxu0 %v1218_v30  ;;  %241 = vrot.lane.b32.xlu1 %v1666_v34, %s1550_s2 }
  0x52   :  { %1221 = vmatpush3.bf16.msra.mxu0 %v1218_v30  ;;  %243 = vrot.lane.b32.xlu0 %v1676_v38, %s1550_s2 }
  0x53   :  { %1223 = vmatprep.subr.bf16.mxu0 %v1222_v35  ;;  %245 = vrot.lane.b32.xlu1 %v1674_v37, %s1550_s2 }
  0x56   :  { %1225 = vmatpush3.bf16.msra.mxu0 %v1222_v35  ;;  %247 = vrot.lane.b32.xlu0 %v1684_v42, %s1550_s2 }
  0x57   :  { %249 = vrot.lane.b32.xlu1 %v1682_v40, %s1550_s2 }
  0x59   :  { %1061 = vmatmul.mubr.f32.vlgmr.msra.gmra.mrb[0].mxu0 %v111_v39 }
  0x5a   :  { %1063 = vmatprep.mubr.f32.mxu0 %v112_v41 }
  0x5d   :  { %1064 = vmatmul.mubr.f32.gmra.mrb[2].mxu0 %v113_v43 }
  0xac   :  { %v220_v45 = vpop.permute.xlu0 %219 }
  0xad   :  { %v224_v44 = vpop.permute.xlu1 %223 }
  0xb0   :  { %v222_v47 = vpop.permute.xlu0 %221 }
  0xb1   :  { %v226_v46 = vpop.permute.xlu1 %225 }
  0xb4   :  { %v228_v49 = vpop.permute.xlu0 %227 }
  0xb5   :  { %v230_v48 = vpop.permute.xlu1 %229 }
  0xb8   :  { %v232_v51 = vpop.permute.xlu0 %231 }
  0xb9   :  { %v234_v50 = vpop.permute.xlu1 %233 }
  0xbc   :  { %v236_v54 = vpop.permute.xlu0 %235 }
  0xbd   :  { %v238_v52 = vpop.permute.xlu1 %237 }
  0xc0   :  { %v240_v63 = vpop.permute.xlu0 %239 }
  0xc1   :  { %v242_v60 = vpop.permute.xlu1 %241 }
  0xc4   :  { %v244_v20 = vpop.permute.xlu0 %243 }
  0xc5   :  { %v246_v10 = vpop.permute.xlu1 %245 }
  0xc8   :  { %v248_v33 = vpop.permute.xlu0 %247 }
  0xc9   :  { %v250_v32 = vpop.permute.xlu1 %249 }
 0x12c   :  { %v1062_v55 = vpop.f32.mrb[0].mxu0 }
 0x12d   :  { %v1690_v56 = vadd.f32 %v1062_v55, %v914_v53  ;;  %v184_v57 = vpop.f32.mrb[1].mxu0 }
 0x12e   :  { %v1692_v58 = vadd.f32 %v914_v53, %v184_v57 }
 0x12f   :  { %v268_v59 = vmul.f32 %v222_v47, %v1690_v56  ;;  %v272_v5 = vmul.f32 %v230_v48, %v1690_v56  ;;  %v276_v18 = vmul.f32 %v238_v52, %v1690_v56  ;;  %v280_v23 = vmul.f32 %v246_v10, %v1690_v56 }
 0x130   :  { %v1065_v61 = vpop.f32.mrb[2].mxu0  ;;  %1098 = vmatprep.mubr.msk.f32.mxu1 %vm399_vm0, %v1692_v58  ;;  %v267_v62 = vmul.f32 %v220_v45, %v1692_v58  ;;  %v271_v4 = vmul.f32 %v228_v49, %v1692_v58  ;;  %v275_v17 = vmul.f32 %v236_v54, %v1692_v58  ;;  %v279_v25 = vmul.f32 %v244_v20, %v1692_v58 }
 0x131   :  { %v1698_v0 = vadd.f32 %v1065_v61, %v914_v53  ;;  %v194_v1 = vpop.f32.mrb[3].mxu0 }
 0x132   :  { %v1700_v2 = vadd.f32 %v914_v53, %v194_v1  ;;  %v1355_v3 = vpack.i.bf16 %v268_v59, %v267_v62  ;;  %v1365_v15 = vpack.i.bf16 %v272_v5, %v271_v4  ;;  %v1375_v27 = vpack.i.bf16 %v276_v18, %v275_v17 }
 0x133   :  { %v270_v6 = vmul.f32 %v226_v46, %v1698_v0  ;;  %v274_v9 = vmul.f32 %v234_v50, %v1698_v0  ;;  %v278_v30 = vmul.f32 %v242_v60, %v1698_v0  ;;  %v1385_v35 = vpack.i.bf16 %v280_v23, %v279_v25  ;;  %v94_v25 = vld [vmem:[#allocation7 + $0x128] sm:$0xff] }
 0x134   :  { %1356 = vrot.lane.b32.xlu0 %v1355_v3, %s1551_s21  ;;  %v269_v7 = vmul.f32 %v224_v44, %v1700_v2  ;;  %v273_v8 = vmul.f32 %v232_v51, %v1700_v2  ;;  %v277_v28 = vmul.f32 %v240_v63, %v1700_v2  ;;  %v282_v39 = vmul.f32 %v250_v32, %v1698_v0  ;;  %v97_v32 = vld [vmem:[#allocation7 + $0x140] sm:$0xff] }
 0x135   :  { %v281_v41 = vmul.f32 %v248_v33, %v1700_v2 }
 0x136   :  { %v1360_v11 = vpack.i.bf16 %v270_v6, %v269_v7  ;;  %v1370_v22 = vpack.i.bf16 %v274_v9, %v273_v8  ;;  %v1380_v43 = vpack.i.bf16 %v278_v30, %v277_v28  ;;  %v96_v28 = vld [vmem:[#allocation7 + $0x138] sm:$0xff] }
 0x137   :  { %v1390_v44 = vpack.i.bf16 %v282_v39, %v281_v41  ;;  %v1278_v33 = vpack.c.bf16 %v97_v32, %v96_v28  ;;  %v99_v39 = vld [vmem:[#allocation7 + $0x150] sm:$0xff] }
 0x138   :  { %1361 = vrot.lane.b32.xlu1 %v1360_v11, %s1551_s21  ;;  %1366 = vrot.lane.b32.xlu0 %v1365_v15, %s1551_s21 }
 0x13c   :  { %1371 = vrot.lane.b32.xlu1 %v1370_v22, %s1551_s21  ;;  %1376 = vrot.lane.b32.xlu0 %v1375_v27, %s1551_s21  ;;  %v95_v27 = vld [vmem:[#allocation7 + $0x130] sm:$0xff] }
 0x13d   :  { %v1274_v30 = vpack.c.bf16 %v95_v27, %v94_v25 }
 0x13f   :  { %1275 = vmatprep.subr.bf16.mxu0 %v1274_v30 }
 0x140   :  { %1381 = vrot.lane.b32.xlu1 %v1380_v43, %s1551_s21  ;;  %1386 = vrot.lane.b32.xlu0 %v1385_v35, %s1551_s21  ;;  %v98_v35 = vld [vmem:[#allocation7 + $0x148] sm:$0xff]  ;;  %v100_v43 = vld [vmem:[#allocation7 + $0x158] sm:$0xff] }
 0x141   :  { %1277 = vmatpush3.bf16.msra.mxu0 %v1274_v30  ;;  %v1282_v41 = vpack.c.bf16 %v99_v39, %v98_v35 }
 0x142   :  { %1279 = vmatprep.subr.bf16.mxu0 %v1278_v33 }
 0x144   :  { %1391 = vrot.lane.b32.xlu1 %v1390_v44, %s1551_s21  ;;  %v101_v44 = vld [vmem:[#allocation7 + $0x160] sm:$0xff] }
 0x145   :  { %1281 = vmatpush3.bf16.msra.mxu0 %v1278_v33 }
 0x146   :  { %1283 = vmatprep.subr.bf16.mxu0 %v1282_v41 }
 0x149   :  { %1285 = vmatpush3.bf16.msra.mxu0 %v1282_v41 }
 0x1a6   :  { %v1357_v45 = vpop.permute.xlu0 %1356 }
 0x1a7   :  { %v1359_v46 = vunpack.i.h.bf16 %v1357_v45  ;;  %v1358_v47 = vunpack.i.l.bf16 %v1357_v45  ;;  %v1286_v45 = vpack.c.bf16 %v101_v44, %v100_v43 }
 0x1a9   :  { %v1226_v49 = vpack.c.bf16 %v1359_v46, %v1358_v47  ;;  %1287 = vmatprep.subr.bf16.mxu0 %v1286_v45  ;;  %v348_v46 = vld [vmem:[#allocation5 + $0x8] sm:$0xff]  ;;  %v347_v47 = vld [vmem:[#allocation5] sm:$0xff] }
 0x1aa   :  { %v1362_v50 = vpop.permute.xlu1 %1361  ;;  %v1367_v53 = vpop.permute.xlu0 %1366  ;;  %1289 = vmatpush3.bf16.msra.mxu0 %v1286_v45 }
 0x1ab   :  { %v1364_v51 = vunpack.i.h.bf16 %v1362_v50  ;;  %v1363_v52 = vunpack.i.l.bf16 %v1362_v50  ;;  %1228 = vmatprep.subr.msk.bf16.mxu1 %vm1718_vm1, %v1226_v49  ;;  %v1369_v55 = vunpack.i.h.bf16 %v1367_v53  ;;  %v1368_v57 = vunpack.i.l.bf16 %v1367_v53 }
 0x1ac   :  { %1231 = vmatpush3.bf16.xpose.msk.msra.mxu1 %vm1718_vm1, %v1226_v49 }
 0x1ad   :  { %v1232_v54 = vpack.c.bf16 %v1364_v51, %v1363_v52  ;;  %v1238_v59 = vpack.c.bf16 %v1369_v55, %v1368_v57  ;;  %v349_v52 = vld [vmem:[#allocation5 + $0x10] sm:$0xff]  ;;  %v350_v57 = vld [vmem:[#allocation5 + $0x18] sm:$0xff] }
 0x1ae   :  { %v1372_v60 = vpop.permute.xlu1 %1371  ;;  %v1377_v1 = vpop.permute.xlu0 %1376 }
 0x1af   :  { %1234 = vmatprep.subr.msk.bf16.mxu1 %vm1718_vm1, %v1232_v54  ;;  %v1374_v61 = vunpack.i.h.bf16 %v1372_v60  ;;  %v1373_v62 = vunpack.i.l.bf16 %v1372_v60  ;;  %v1379_v3 = vunpack.i.h.bf16 %v1377_v1  ;;  %v1378_v4 = vunpack.i.l.bf16 %v1377_v1  ;;  %v102_v60 = vld [vmem:[#allocation7 + $0x168] sm:$0xff]  ;;  %v105_v1 = vld [vmem:[#allocation7 + $0x180] sm:$0xff] }
 0x1b1   :  { %v1244_v63 = vpack.c.bf16 %v1374_v61, %v1373_v62  ;;  %v1250_v5 = vpack.c.bf16 %v1379_v3, %v1378_v4  ;;  %v103_v61 = vld [vmem:[#allocation7 + $0x170] sm:$0xff]  ;;  %v106_v4 = vld [vmem:[#allocation7 + $0x188] sm:$0xff] }
 0x1b2   :  { %v1382_v6 = vpop.permute.xlu1 %1381  ;;  %v1387_v10 = vpop.permute.xlu0 %1386  ;;  %v1290_v62 = vpack.c.bf16 %v103_v61, %v102_v60 }
 0x1b3   :  { %v1384_v7 = vunpack.i.h.bf16 %v1382_v6  ;;  %v1383_v8 = vunpack.i.l.bf16 %v1382_v6  ;;  %v1389_v11 = vunpack.i.h.bf16 %v1387_v10  ;;  %v1388_v15 = vunpack.i.l.bf16 %v1387_v10 }
 0x1b4   :  { %1237 = vmatpush3.bf16.xpose.msk.msra.mxu1 %vm1718_vm1, %v1232_v54  ;;  %1291 = vmatprep.subr.bf16.mxu0 %v1290_v62 }
 0x1b5   :  { %1240 = vmatprep.subr.msk.bf16.mxu1 %vm1718_vm1, %v1238_v59  ;;  %v1256_v9 = vpack.c.bf16 %v1384_v7, %v1383_v8  ;;  %v1262_v17 = vpack.c.bf16 %v1389_v11, %v1388_v15  ;;  %1293 = vmatpush3.bf16.msra.mxu0 %v1290_v62  ;;  %v108_v7 = vld [vmem:[#allocation7 + $0x198] sm:$0xff]  ;;  %v109_v8 = vld [vmem:[#allocation7 + $0x1a0] sm:$0xff] }
 0x1b6   :  { %v1392_v18 = vpop.permute.xlu1 %1391 }
 0x1b7   :  { %v1394_v20 = vunpack.i.h.bf16 %v1392_v18  ;;  %v1393_v22 = vunpack.i.l.bf16 %v1392_v18 }
 0x1b9   :  { %v1268_v23 = vpack.c.bf16 %v1394_v20, %v1393_v22 }
 0x1bc   :  { %1243 = vmatpush3.bf16.xpose.msk.msra.mxu1 %vm1718_vm1, %v1238_v59 }
 0x1bd   :  { %1246 = vmatprep.subr.msk.bf16.mxu1 %vm1718_vm1, %v1244_v63 }
 0x1c4   :  { %1249 = vmatpush3.bf16.xpose.msk.msra.mxu1 %vm1718_vm1, %v1244_v63  ;;  %v104_v63 = vld [vmem:[#allocation7 + $0x178] sm:$0xff] }
 0x1c5   :  { %1252 = vmatprep.subr.msk.bf16.mxu1 %vm1718_vm1, %v1250_v5  ;;  %v1294_v3 = vpack.c.bf16 %v105_v1, %v104_v63 }
 0x1c7   :  { %1295 = vmatprep.subr.bf16.mxu0 %v1294_v3 }
 0x1c8   :  { %1297 = vmatpush3.bf16.msra.mxu0 %v1294_v3 }
 0x1cc   :  { %1255 = vmatpush3.bf16.xpose.msk.msra.mxu1 %vm1718_vm1, %v1250_v5  ;;  %v107_v5 = vld [vmem:[#allocation7 + $0x190] sm:$0xff] }
 0x1cd   :  { %1258 = vmatprep.subr.msk.bf16.mxu1 %vm1718_vm1, %v1256_v9  ;;  %v1298_v6 = vpack.c.bf16 %v107_v5, %v106_v4 }
 0x1cf   :  { %1299 = vmatprep.subr.bf16.mxu0 %v1298_v6 }
 0x1d0   :  { %1301 = vmatpush3.bf16.msra.mxu0 %v1298_v6  ;;  %v74_v6 = vld [vmem:[#allocation7 + $0x88] sm:$0xff] }
 0x1d4   :  { %1261 = vmatpush3.bf16.xpose.msk.msra.mxu1 %vm1718_vm1, %v1256_v9 }
 0x1d5   :  { %1264 = vmatprep.subr.msk.bf16.mxu1 %vm1718_vm1, %v1262_v17 }
 0x1dc   :  { %1267 = vmatpush3.bf16.xpose.msk.msra.mxu1 %vm1718_vm1, %v1262_v17 }
 0x1dd   :  { %1270 = vmatprep.subr.msk.bf16.mxu1 %vm1718_vm1, %v1268_v23 }
 0x1e4   :  { %1273 = vmatpush3.bf16.xpose.msk.msra.mxu1 %vm1718_vm1, %v1268_v23 }
 0x1eb   :  { %1099 = vmatmul.mubr.msk.f32.vlgmr.msra.gmra.mrb[0].mxu1 %vm399_vm0, %v1690_v56 }
 0x1ec   :  { %1101 = vmatprep.mubr.msk.f32.mxu1 %vm399_vm0, %v1700_v2 }
 0x1ef   :  { %1102 = vmatmul.mubr.msk.f32.gmra.mrb[2].mxu1 %vm399_vm0, %v1698_v0 }
 0x2be   :  { %v1100_v48 = vpop.f32.mrb[0].mxu1 }
 0x2bf   :  { %v516_v49 = vadd.f32 %v1100_v48, %v348_v46  ;;  %v510_v50 = vpop.f32.mrb[1].mxu1 }
 0x2c0   :  { %v511_v51 = vadd.f32 %v510_v50, %v347_v47 }
 0x2c1   :  { %531 = vmax.xlane.f32.xlu1 %v516_v49 }
 0x2c2   :  { %v1103_v53 = vpop.f32.mrb[2].mxu1  ;;  %529 = vmax.xlane.f32.xlu0 %v511_v51 }
 0x2c3   :  { %v520_v54 = vpop.f32.mrb[3].mxu1  ;;  %v526_v59 = vadd.f32 %v1103_v53, %v350_v57 }
 0x2c4   :  { %v521_v55 = vadd.f32 %v520_v54, %v349_v52 }
 0x2c6   :  { %533 = vmax.xlane.f32.xlu0 %v521_v55 }
 0x2ca   :  { %535 = vmax.xlane.f32.xlu0 %v526_v59 }
 0x2d2   :  { %283 = vrot.lane.b32.xlu1 %v1630_v13, %s1552_s22  ;;  %v1302_v13 = vpack.c.bf16 %v109_v8, %v108_v7  ;;  %v75_v7 = vld [vmem:[#allocation7 + $0x90] sm:$0xff] }
 0x2d3   :  { %v1338_v8 = vpack.c.bf16 %v75_v7, %v74_v6 }
 0x2d4   :  { %1303 = vmatprep.subr.bf16.mxu0 %v1302_v13 }
 0x2d5   :  { %1305 = vmatpush3.bf16.msra.mxu0 %v1302_v13  ;;  %v77_v13 = vld [vmem:[#allocation7 + $0xa0] sm:$0xff]  ;;  %1339 = vmatprep.subr.bf16.mxu1 %v1338_v8 }
 0x2d6   :  { %287 = vrot.lane.b32.xlu1 %v1626_v12, %s1552_s22  ;;  %1341 = vmatpush3.bf16.msra.mxu1 %v1338_v8 }
 0x2da   :  { %289 = vrot.lane.b32.xlu1 %v1634_v14, %s1552_s22 }
 0x2de   :  { %293 = vrot.lane.b32.xlu1 %v1642_v19, %s1552_s22 }
 0x2e0   :  { %285 = vrot.lane.b32.xlu0 %v1636_v16, %s1552_s22 }
 0x2e2   :  { %297 = vrot.lane.b32.xlu1 %v1650_v24, %s1552_s22 }
 0x2e4   :  { %291 = vrot.lane.b32.xlu0 %v1644_v21, %s1552_s22 }
 0x2e6   :  { %301 = vrot.lane.b32.xlu1 %v1658_v29, %s1552_s22 }
 0x2e8   :  { %295 = vrot.lane.b32.xlu0 %v1652_v26, %s1552_s22 }
 0x2ea   :  { %305 = vrot.lane.b32.xlu1 %v1666_v34, %s1552_s22 }
 0x2ec   :  { %299 = vrot.lane.b32.xlu0 %v1660_v31, %s1552_s22 }
 0x2ee   :  { %309 = vrot.lane.b32.xlu1 %v1674_v37, %s1552_s22 }
 0x2f0   :  { %303 = vrot.lane.b32.xlu0 %v1668_v36, %s1552_s22 }
 0x2f2   :  { %313 = vrot.lane.b32.xlu1 %v1682_v40, %s1552_s22 }
 0x2f4   :  { %307 = vrot.lane.b32.xlu0 %v1676_v38, %s1552_s22 }
 0x2f8   :  { %311 = vrot.lane.b32.xlu0 %v1684_v42, %s1552_s22 }
 0x34e   :  { %v532_v12 = vpop.xlane.xlu1 %531 }
 0x34f   :  { %v538_v14 = vsub.f32 %v516_v49, %v532_v12  ;;  %v530_v16 = vpop.xlane.xlu0 %529 }
 0x350   :  { %v537_v19 = vsub.f32 %v511_v51, %v530_v16 }
 0x351   :  { %v543_v21 = vmul.f32 1.442695, %v538_v14 }
 0x352   :  { %v541_v24 = vmul.f32 1.442695, %v537_v19  ;;  %v284_v26 = vpop.permute.xlu1 %283 }
 0x353   :  { %v534_v29 = vpop.xlane.xlu0 %533  ;;  %v331_v15 = vmul.f32 %v284_v26, %v1692_v58 }
 0x354   :  { %1435 = vpow2.f32 %v541_v24  ;;  %v539_v31 = vsub.f32 %v521_v55, %v534_v29 }
 0x355   :  { %1437 = vpow2.f32 %v543_v21 }
 0x356   :  { %v545_v34 = vmul.f32 1.442695, %v539_v31  ;;  %v288_v36 = vpop.permute.xlu1 %287 }
 0x357   :  { %v536_v37 = vpop.xlane.xlu0 %535  ;;  %v333_v42 = vmul.f32 %v288_v36, %v1700_v2 }
 0x358   :  { %1439 = vpow2.f32 %v545_v34  ;;  %v540_v40 = vsub.f32 %v526_v59, %v536_v37 }
 0x35a   :  { %v547_v38 = vmul.f32 1.442695, %v540_v40  ;;  %v290_v9 = vpop.permute.xlu1 %289 }
 0x35b   :  { %v334_v10 = vmul.f32 %v290_v9, %v1698_v0  ;;  %v286_v11 = vpop.permute.xlu0 %285 }
 0x35c   :  { %1441 = vpow2.f32 %v547_v38  ;;  %v332_v17 = vmul.f32 %v286_v11, %v1690_v56 }
 0x35d   :  { %v1400_v18 = vpack.i.bf16 %v334_v10, %v333_v42 }
 0x35e   :  { %v1796_v20 = vpop.eup %1435  ;;  %v1395_v22 = vpack.i.bf16 %v332_v17, %v331_v15  ;;  %v294_v23 = vpop.permute.xlu1 %293 }
 0x35f   :  { %v1798_v25 = vpop.eup %1437  ;;  %v336_v27 = vmul.f32 %v294_v23, %v1690_v56  ;;  %1401 = vrot.lane.b32.xlu1 %v1400_v18, %s1552_s22  ;;  %1136 = vmatprep.mubr.f32.mxu0 %v1796_v20  ;;  %v292_v28 = vpop.permute.xlu0 %291 }
 0x360   :  { %v335_v30 = vmul.f32 %v292_v28, %v1692_v58  ;;  %1137 = vmatmul.mubr.f32.vlgmr.msra.gmra.mrb[4].mxu0 %v1798_v25  ;;  %1396 = vrot.lane.b32.xlu0 %v1395_v22, %s1552_s22 }
 0x362   :  { %v1806_v32 = vpop.eup %1439  ;;  %v1405_v33 = vpack.i.bf16 %v336_v27, %v335_v30  ;;  %v298_v35 = vpop.permute.xlu1 %297 }
 0x363   :  { %v338_v39 = vmul.f32 %v298_v35, %v1698_v0  ;;  %1139 = vmatprep.mubr.f32.mxu0 %v1806_v32  ;;  %v296_v41 = vpop.permute.xlu0 %295 }
 0x364   :  { %v337_v43 = vmul.f32 %v296_v41, %v1700_v2  ;;  %1406 = vrot.lane.b32.xlu0 %v1405_v33, %s1552_s22 }
 0x366   :  { %v1812_v44 = vpop.eup %1441  ;;  %v1410_v45 = vpack.i.bf16 %v338_v39, %v337_v43  ;;  %v302_v46 = vpop.permute.xlu1 %301 }
 0x367   :  { %v340_v47 = vmul.f32 %v302_v46, %v1690_v56  ;;  %1140 = vmatmul.mubr.f32.gmra.mrb[6].mxu0 %v1812_v44  ;;  %v300_v48 = vpop.permute.xlu0 %299 }
 0x368   :  { %v339_v49 = vmul.f32 %v300_v48, %v1692_v58  ;;  %1411 = vrot.lane.b32.xlu1 %v1410_v45, %s1552_s22 }
 0x36a   :  { %v1415_v50 = vpack.i.bf16 %v340_v47, %v339_v49  ;;  %v306_v51 = vpop.permute.xlu1 %305 }
 0x36b   :  { %v342_v52 = vmul.f32 %v306_v51, %v1698_v0  ;;  %v304_v53 = vpop.permute.xlu0 %303 }
 0x36c   :  { %v341_v54 = vmul.f32 %v304_v53, %v1700_v2  ;;  %1416 = vrot.lane.b32.xlu0 %v1415_v50, %s1552_s22 }
 0x36e   :  { %v1420_v55 = vpack.i.bf16 %v342_v52, %v341_v54  ;;  %v310_v57 = vpop.permute.xlu1 %309 }
 0x36f   :  { %v344_v59 = vmul.f32 %v310_v57, %v1690_v56  ;;  %v308_v60 = vpop.permute.xlu0 %307  ;;  %v76_v56 = vld [vmem:[#allocation7 + $0x98] sm:$0xff] }
 0x370   :  { %v343_v61 = vmul.f32 %v308_v60, %v1692_v58  ;;  %1421 = vrot.lane.b32.xlu1 %v1420_v55, %s1552_s22  ;;  %v1342_v58 = vpack.c.bf16 %v77_v13, %v76_v56 }
 0x372   :  { %v1425_v62 = vpack.i.bf16 %v344_v59, %v343_v61  ;;  %v314_v63 = vpop.permute.xlu1 %313  ;;  %1343 = vmatprep.subr.bf16.mxu1 %v1342_v58 }
 0x373   :  { %v346_v1 = vmul.f32 %v314_v63, %v1698_v0  ;;  %v312_v3 = vpop.permute.xlu0 %311  ;;  %1345 = vmatpush3.bf16.msra.mxu1 %v1342_v58 }
 0x374   :  { %v345_v4 = vmul.f32 %v312_v3, %v1700_v2  ;;  %1426 = vrot.lane.b32.xlu0 %v1425_v62, %s1552_s22 }
 0x376   :  { %v1430_v5 = vpack.i.bf16 %v346_v1, %v345_v4 }
 0x378   :  { %1431 = vrot.lane.b32.xlu1 %v1430_v5, %s1552_s22 }
 0x3d1   :  { %v1402_v12 = vpop.permute.xlu1 %1401 }
 0x3d2   :  { %v1397_v14 = vpop.permute.xlu0 %1396  ;;  %v1404_v0 = vunpack.i.h.bf16 %v1402_v12  ;;  %v1403_v16 = vunpack.i.l.bf16 %v1402_v12 }
 0x3d3   :  { %v1399_v19 = vunpack.i.h.bf16 %v1397_v14  ;;  %v1398_v2 = vunpack.i.l.bf16 %v1397_v14 }
 0x3d4   :  { %v1310_v26 = vpack.c.bf16 %v1404_v0, %v1403_v16 }
 0x3d5   :  { %v1306_v21 = vpack.c.bf16 %v1399_v19, %v1398_v2 }
 0x3d6   :  { %v1407_v24 = vpop.permute.xlu0 %1406 }
 0x3d7   :  { %v1409_v29 = vunpack.i.h.bf16 %v1407_v24  ;;  %v1408_v31 = vunpack.i.l.bf16 %v1407_v24  ;;  %1307 = vmatprep.subr.bf16.mxu0 %v1306_v21 }
 0x3d8   :  { %1309 = vmatpush3.bf16.msra.mxu0 %v1306_v21 }
 0x3d9   :  { %1311 = vmatprep.subr.bf16.mxu0 %v1310_v26  ;;  %v1314_v36 = vpack.c.bf16 %v1409_v29, %v1408_v31 }
 0x3da   :  { %v1412_v34 = vpop.permute.xlu1 %1411 }
 0x3db   :  { %v1414_v37 = vunpack.i.h.bf16 %v1412_v34  ;;  %v1413_v40 = vunpack.i.l.bf16 %v1412_v34 }
 0x3dc   :  { %1313 = vmatpush3.bf16.msra.mxu0 %v1310_v26 }
 0x3dd   :  { %1315 = vmatprep.subr.bf16.mxu0 %v1314_v36  ;;  %v1318_v9 = vpack.c.bf16 %v1414_v37, %v1413_v40 }
 0x3de   :  { %v1417_v38 = vpop.permute.xlu0 %1416 }
 0x3df   :  { %v1419_v42 = vunpack.i.h.bf16 %v1417_v38  ;;  %v1418_v10 = vunpack.i.l.bf16 %v1417_v38 }
 0x3e0   :  { %1317 = vmatpush3.bf16.msra.mxu0 %v1314_v36 }
 0x3e1   :  { %1319 = vmatprep.subr.bf16.mxu0 %v1318_v9  ;;  %v1322_v15 = vpack.c.bf16 %v1419_v42, %v1418_v10 }
 0x3e2   :  { %v1422_v11 = vpop.permute.xlu1 %1421 }
 0x3e3   :  { %v1424_v17 = vunpack.i.h.bf16 %v1422_v11  ;;  %v1423_v18 = vunpack.i.l.bf16 %v1422_v11 }
 0x3e4   :  { %1321 = vmatpush3.bf16.msra.mxu0 %v1318_v9 }
 0x3e5   :  { %1323 = vmatprep.subr.bf16.mxu0 %v1322_v15  ;;  %v1326_v23 = vpack.c.bf16 %v1424_v17, %v1423_v18 }
 0x3e6   :  { %v1427_v22 = vpop.permute.xlu0 %1426 }
 0x3e7   :  { %v1429_v27 = vunpack.i.h.bf16 %v1427_v22  ;;  %v1428_v28 = vunpack.i.l.bf16 %v1427_v22 }
 0x3e8   :  { %1325 = vmatpush3.bf16.msra.mxu0 %v1322_v15 }
 0x3e9   :  { %1327 = vmatprep.subr.bf16.mxu0 %v1326_v23  ;;  %v1330_v33 = vpack.c.bf16 %v1429_v27, %v1428_v28 }
 0x3ea   :  { %v1432_v30 = vpop.permute.xlu1 %1431 }
 0x3eb   :  { %v1434_v35 = vunpack.i.h.bf16 %v1432_v30  ;;  %v1433_v39 = vunpack.i.l.bf16 %v1432_v30 }
 0x3ec   :  { %1329 = vmatpush3.bf16.msra.mxu0 %v1326_v23 }
 0x3ed   :  { %1331 = vmatprep.subr.bf16.mxu0 %v1330_v33  ;;  %v1334_v41 = vpack.c.bf16 %v1434_v35, %v1433_v39 }
 0x3f0   :  { %1333 = vmatpush3.bf16.msra.mxu0 %v1330_v33 }
 0x3f1   :  { %1335 = vmatprep.subr.bf16.mxu0 %v1334_v41 }
 0x3f4   :  { %1337 = vmatpush3.bf16.msra.mxu0 %v1334_v41 }
 0x433   :  { %v1138_v43 = vpop.f32.mrb[4].mxu0 }
 0x434   :  { %v621_v45 = vadd.f32 1e-30, %v1138_v43  ;;  %v615_v46 = vpop.f32.mrb[5].mxu0 }
 0x435   :  { %v616_v47 = vadd.f32 1e-30, %v615_v46 }
 0x436   :  { %1443 = vrcp.f32 %v621_v45 }
 0x437   :  { %1445 = vrcp.f32 %v616_v47 }
 0x43a   :  { %v1141_v48 = vpop.f32.mrb[6].mxu0 }
 0x43b   :  { %v631_v49 = vadd.f32 1e-30, %v1141_v48  ;;  %v625_v50 = vpop.f32.mrb[7].mxu0 }
 0x43c   :  { %v626_v51 = vadd.f32 1e-30, %v625_v50 }
 0x43d   :  { %1447 = vrcp.f32 %v631_v49 }
 0x43e   :  { %1449 = vrcp.f32 %v626_v51 }
 0x440   :  { %v1444_v52 = vpop.eup %1443 }
 0x441   :  { %v1446_v53 = vpop.eup %1445  ;;  %v639_v55 = vmul.f32 %v1444_v52, %v1798_v25  ;;  %v935_v25 = vld [vmem:[#allocation7 + $0x81] ss:$0 sm:$0xff] }
 0x442   :  { %v638_v54 = vmul.f32 %v1446_v53, %v1796_v20 }
 0x444   :  { %1174 = vmatprep.mubr.f32.mxu0 %v638_v54 }
 0x445   :  { %1175 = vmatmul.mubr.f32.vlgmr.msra.gmra.mrb[8].mxu0 %v639_v55 }
 0x447   :  { %v1448_v57 = vpop.eup %1447 }
 0x448   :  { %v1450_v59 = vpop.eup %1449  ;;  %v641_v61 = vmul.f32 %v1448_v57, %v1812_v44 }
 0x449   :  { %v640_v60 = vmul.f32 %v1450_v59, %v1806_v32 }
 0x44b   :  { %1177 = vmatprep.mubr.f32.mxu0 %v640_v60 }
 0x44c   :  { %1178 = vmatmul.mubr.f32.gmra.mrb[10].mxu0 %v641_v61 }
 0x518   :  { %v1176_v62 = vpop.f32.mrb[8].mxu0 }
 0x519   :  { %v772_v63 = vpop.f32.mrb[9].mxu0 }
 0x51a   :  { %1188 = vmatprep.mubr.msk.f32.mxu1 %vm399_vm0, %v772_v63 }
 0x51b   :  { %1189 = vmatmul.mubr.msk.f32.vlgmr.msra.gmra.mrb[4].mxu1 %vm399_vm0, %v1176_v62 }
 0x51f   :  { %v1179_v1 = vpop.f32.mrb[10].mxu0 }
 0x520   :  { %v782_v20 = vpop.f32.mrb[11].mxu0 }
 0x521   :  { %1191 = vmatprep.mubr.msk.f32.mxu1 %vm399_vm0, %v782_v20 }
 0x522   :  { %1192 = vmatmul.mubr.msk.f32.gmra.mrb[6].mxu1 %vm399_vm0, %v1179_v1 }
 0x5ee   :  { %v1190_v3 = vpop.f32.mrb[4].mxu1 }
 0x5ef   :  { %v879_v4 = vadd.f32 %v1190_v3, %v935_v25  ;;  %v873_v32 = vpop.f32.mrb[5].mxu1 }
 0x5f0   :  { %v874_v5 = vadd.f32 %v935_v25, %v873_v32 }
 0x5f1   :  { %893 = vst [vmem:[#allocation8 + $0x8] sm:$0xff] %v879_v4 }
 0x5f2   :  { %892 = vst [vmem:[#allocation8] sm:$0xff] %v874_v5 }
 0x5f5   :  { %v1193_v44 = vpop.f32.mrb[6].mxu1 }
 0x5f6   :  { %v889_v6 = vadd.f32 %v1193_v44, %v935_v25  ;;  %v883_v7 = vpop.f32.mrb[7].mxu1 }
 0x5f7   :  { %v884_v56 = vadd.f32 %v935_v25, %v883_v7 }
 0x5f8   :  { %895 = vst [vmem:[#allocation8 + $0x18] sm:$0xff] %v889_v6 }
 0x5f9   :  { %894 = vst [vmem:[#allocation8 + $0x10] sm:$0xff] %v884_v56 }
 0x5fa   :  { %1528 = shalt.err (!%p1525_p0)
}
 0x5fb   :  { %s1529_s30 = scalar_lea.hbm %s1854_s3, 512 }
 0x5fc   :  { %p1530_p1 = scmp.ne.s32.totalorder %s1854_s3, %s1529_s30  ;;  %p1533_p2 = scmp.lt.u32.totalorder %s1529_s30, %s1854_s3 }
 0x5fe   :  { %p1535_p3 = pnand %p1533_p2, %p1530_p1 }
 0x600   :  { %1538 = shalt.err (!%p1535_p3)
}
 0x601   :  { %907 = dma.vmem_to_hbm [thread:$0]  %s902_s26, 512, %s1854_s3, [#allocation4], %s1547_s24, %s1547_s24, %s1548_s25  }
 0x602   :  { %1543 = dma.done.wait [#allocation4], 512  }
 0x603   :  { %1544 = vsyncadd [#allocation4], 4294966784 }
 0x604   :  { %911 = vsyncpa [#allocation3], 1 }
 0x605   :  { %912 = vsyncpa [#allocation6], 1 }
 0x606   :  { %913 = vsyncpa [#allocation4], 1 }

</bundles_post_ra>
